<compile_context>
chip_gen: v7x
topology: tpu7x:2x2x1
jax: 0.10.0
libtpu: 0.0.40
codegen_flags: <defaults>
</compile_context>

<pallas_src>
import jax
import jax.numpy as jnp
from jax.experimental import pallas as pl
from jax.experimental.pallas import tpu as pltpu


_DOT_KWARGS = dict(precision=jax.lax.Precision.HIGHEST,
                   preferred_element_type=jnp.float32)


# --------------------------------------------------------------------------
# Small constant matrices used for window pooling / selection on the MXU
# --------------------------------------------------------------------------
def _left_matrix(out_n, in_n, s, avg):
    """(out_n, in_n): avg -> rows of 1/s over each window; else one-hot at i*s."""
    i = jax.lax.broadcasted_iota(jnp.int32, (out_n, in_n), 0)   # output index
    j = jax.lax.broadcasted_iota(jnp.int32, (out_n, in_n), 1)   # input index
    if avg:
        m = (j >= i * s) & (j < (i + 1) * s)
        return m.astype(jnp.float32) * jnp.float32(1.0 / s)
    return (j == i * s).astype(jnp.float32)


def _right_matrix(in_n, out_n, s, avg):
    """(in_n, out_n): avg -> columns of 1/s over each window; else one-hot at i*s."""
    j = jax.lax.broadcasted_iota(jnp.int32, (in_n, out_n), 0)   # input index
    i = jax.lax.broadcasted_iota(jnp.int32, (in_n, out_n), 1)   # output index
    if avg:
        m = (j >= i * s) & (j < (i + 1) * s)
        return m.astype(jnp.float32) * jnp.float32(1.0 / s)
    return (j == i * s).astype(jnp.float32)


def _sigmoid(v):
    # EUP tanh identity: sigmoid(x) = 0.5 * (tanh(x/2) + 1)
    return 0.5 * (jnp.tanh(0.5 * v) + 1.0)


# --------------------------------------------------------------------------
# Fused conv1x1 + sigmoid + multi-scale pooling kernel
# --------------------------------------------------------------------------
def _make_fused_kernel(scales, pooling_type, O, C, H, W):
    scales = tuple(int(s) for s in scales)
    if pooling_type == 'max':
        combine = jnp.maximum
    elif pooling_type == 'min':
        combine = jnp.minimum
    elif pooling_type == 'avg':
        combine = None
    else:
        raise ValueError('Invalid pooling type')

    avg = pooling_type == 'avg'
    has_identity = 1 in scales
    # max/min commute with the monotone sigmoid: if the identity scale is absent,
    # pool the pre-sigmoid conv output and sigmoid only the pooled result.
    pool_pre_sigmoid = (not has_identity) and (not avg)

    def kernel(x_ref, w_ref, b_ref, *out_refs):
        # x_ref: (1, C, H, W) VMEM    w_ref: (O*C,) SMEM    b_ref: (O,) SMEM

        # ---- per-scale pooling / selection matrices (hoisted out of o-loop) ----
        mats = []
        for s in scales:
            if s == 1:
                mats.append(None)
                continue
            Ho, Wo = H // s, W // s
            if avg:
                mats.append((_left_matrix(Ho, H, s, True),
                             _right_matrix(W, Wo, s, True)))
            else:
                mats.append((_left_matrix(Ho, H - s + 1, s, False),
                             _right_matrix(W - s + 1, Wo, s, False)))

        for o in range(O):
            # ---- 1x1 conv: VPU weighted channel sum (scalar weights in SMEM) ----
            z = w_ref[o * C] * x_ref[0, 0]
            for c in range(1, C):
                z = z + w_ref[o * C + c] * x_ref[0, c]
            z = z + b_ref[o]

            base = z if pool_pre_sigmoid else _sigmoid(z)

            for idx, s in enumerate(scales):
                o_ref = out_refs[idx]
                if s == 1:
                    o_ref[0, o] = base.astype(o_ref.dtype)
                    continue

                L, R = mats[idx]
                if avg:
                    # avg pooling == two constant matmuls on the idle MXU
                    r = jnp.dot(jnp.dot(L, base, **_DOT_KWARGS), R, **_DOT_KWARGS)
                else:
                    He = H - s + 1
                    We = W - s + 1
                    # H window: shifted-view combine (rows i..i+s-1), then
                    # one-hot row selection (rows i*s) on the MXU.
                    vh = base[0:He, :]
                    for k in range(1, s):
                        vh = combine(vh, base[k:k + He, :])
                    u = jnp.dot(L, vh, **_DOT_KWARGS)           # (Ho, W)
                    # W window: shifted-view combine along lanes, then
                    # one-hot column selection on the MXU.
                    vw = u[:, 0:We]
                    for k in range(1, s):
                        vw = combine(vw, u[:, k:k + We])
                    r = jnp.dot(vw, R, **_DOT_KWARGS)           # (Ho, Wo)

                if pool_pre_sigmoid:
                    r = _sigmoid(r)
                o_ref[0, o] = r.astype(o_ref.dtype)

    return kernel


def multi_scale_forward(x, w, b, scales, pooling_type):
    N, C, H, W = x.shape
    O = w.shape[0]
    scales = [int(s) for s in scales]

    out_shapes, out_specs = [], []
    for s in scales:
        Ho, Wo = (H, W) if s == 1 else (H // s, W // s)
        out_shapes.append(jax.ShapeDtypeStruct((N, O, Ho, Wo), x.dtype))
        out_specs.append(pl.BlockSpec((1, O, Ho, Wo), lambda n: (n, 0, 0, 0)))

    kernel = _make_fused_kernel(tuple(scales), pooling_type, O, C, H, W)

    # One whole-image block per grid step is fastest at the module's default
    # sizes. For very large original_dim, add a second grid axis tiling H in
    # multiples of 8*max(scales) (keeps double-buffered blocks under v7x's
    # 64 MiB VMEM) and split batch-1 work across v7x's two TensorCores.
    outs = pl.pallas_call(
        kernel,
        out_shape=tuple(out_shapes),
        grid=(N,),
        in_specs=[
            pl.BlockSpec((1, C, H, W), lambda n: (n, 0, 0, 0)),
            pl.BlockSpec(memory_space=pltpu.MemorySpace.SMEM),   # weights, flat (O*C,)
            pl.BlockSpec(memory_space=pltpu.MemorySpace.SMEM),   # bias (O,)
        ],
        out_specs=tuple(out_specs),
        compiler_params=pltpu.CompilerParams(dimension_semantics=("parallel",)),
    )(x, w.reshape(-1).astype(jnp.float32), b.astype(jnp.float32))

    if not isinstance(outs, (list, tuple)):
        outs = [outs]
    return list(outs)


# --------------------------------------------------------------------------
# Module wrapper
# --------------------------------------------------------------------------
class MultiScaleExtensionPyramidScaleConsistency:
    def __init__(self, input_channels=16, output_channels=1, scales=(1,),
                 original_dim=(65, 65), pooling_type='max', key=None):
        self.scales = list(scales)
        self.original_dim = original_dim
        self.pooling_type = pooling_type
        if key is None:
            key = jax.random.PRNGKey(0)
        kw, kb = jax.random.split(key)
        # PyTorch Conv2d default init: U(-1/sqrt(fan_in), 1/sqrt(fan_in))
        bound = 1.0 / (input_channels ** 0.5)
        self.weight = jax.random.uniform(kw, (output_channels, input_channels),
                                         jnp.float32, -bound, bound)
        self.bias = jax.random.uniform(kb, (output_channels,),
                                       jnp.float32, -bound, bound)

    def __call__(self, x):
        return multi_scale_forward(x, self.weight, self.bias,
                                   self.scales, self.pooling_type)


# --------------------------------------------------------------------------
# Pure-JAX reference (exact f32 conv; same cropping semantics as PyTorch pools)
# --------------------------------------------------------------------------
def _reference(x, w, b, scales, pooling_type):
    y = (w[None, :, :, None, None] * x[:, None, :, :, :]).sum(axis=2)
    y = jax.nn.sigmoid(y + b[None, :, None, None])
    outs = []
    for s in scales:
        if s == 1:
            outs.append(y)
            continue
        N, O, H, W = y.shape
        Ho, Wo = H // s, W // s
        yr = y[:, :, :Ho * s, :Wo * s].reshape(N, O, Ho, s, Wo, s)
        if pooling_type == 'max':
            outs.append(yr.max(axis=(3, 5)))
        elif pooling_type == 'min':
            outs.append(yr.min(axis=(3, 5)))
        else:
            outs.append(yr.mean(axis=(3, 5)))
    return outs


if __name__ == "__main__":
    key = jax.random.PRNGKey(0)
    kx, kp = jax.random.split(key)

    # (N, C, H, W, O, scales) — second config has no identity scale, so it
    # exercises the pre-sigmoid max/min pooling path and O > 1.
    configs = [
        (2, 16, 16, 16, 1, [1, 2, 4]),
        (2, 16, 20, 20, 2, [2, 5]),
    ]

    for (N, C, H, W, O, scales) in configs:
        x = jax.random.normal(jax.random.fold_in(kx, H), (N, C, H, W), jnp.float32)
        for pooling_type in ("max", "avg", "min"):
            model = MultiScaleExtensionPyramidScaleConsistency(
                input_channels=C, output_channels=O, scales=scales,
                original_dim=(H, W), pooling_type=pooling_type, key=kp)

            outs = jax.block_until_ready(model(x))
            refs = _reference(x, model.weight, model.bias, model.scales,
                              pooling_type)

            for o_arr, r_arr in zip(outs, refs):
                assert o_arr.shape == r_arr.shape, (o_arr.shape, r_arr.shape)
                if not bool(jnp.allclose(o_arr, r_arr, atol=1e-5, rtol=1e-5)):
                    raise AssertionError(
                        f"Pallas output mismatch vs JAX reference "
                        f"(pooling={pooling_type}, scales={scales}, HxW={H}x{W})")

    print("KERNEL_OK")
</pallas_src>

<mosaic_0001>
module attributes {stable_mosaic.version = 11 : i64} {
  func.func @kernel(%arg0: i32, %arg1: memref<1x16x16x16xf32, #tpu.memory_space<vmem>>, %arg2: memref<16xf32, #tpu.memory_space<smem>>, %arg3: memref<1xf32, #tpu.memory_space<smem>>, %arg4: memref<1x1x16x16xf32, #tpu.memory_space<vmem>>, %arg5: memref<1x1x8x8xf32, #tpu.memory_space<vmem>>, %arg6: memref<1x1x4x4xf32, #tpu.memory_space<vmem>>) attributes {dimension_semantics = [#tpu.dimension_semantics<parallel>], iteration_bounds = array<i64: 2>, scalar_prefetch = 0 : i64, scratch_operands = 0 : i64, tpu.core_type = #tpu.core_type<tc>, window_params = [{transform_indices = @transform_0, window_bounds = array<i64: 1, 16, 16, 16>}, {transform_indices = @transform_1, window_bounds = array<i64: 16>}, {transform_indices = @transform_2, window_bounds = array<i64: 1>}, {transform_indices = @transform_3, window_bounds = array<i64: 1, 1, 16, 16>}, {transform_indices = @transform_4, window_bounds = array<i64: 1, 1, 8, 8>}, {transform_indices = @transform_5, window_bounds = array<i64: 1, 1, 4, 4>}]} {
    %0 = tpu.iota {dimensions = array<i32: 0>} : vector<8x15xi32>
    %1 = tpu.iota {dimensions = array<i32: 1>} : vector<8x15xi32>
    %c2_i32 = arith.constant 2 : i32
    %2 = vector.broadcast %c2_i32 : i32 to vector<8x15xi32>
    %3 = arith.muli %0, %2 : vector<8x15xi32>
    %4 = arith.cmpi eq, %1, %3 : vector<8x15xi32>
    %5 = arith.extui %4 : vector<8x15xi1> to vector<8x15xi32>
    %6 = arith.sitofp %5 : vector<8x15xi32> to vector<8x15xf32>
    %7 = tpu.iota {dimensions = array<i32: 0>} : vector<15x8xi32>
    %8 = tpu.iota {dimensions = array<i32: 1>} : vector<15x8xi32>
    %c2_i32_0 = arith.constant 2 : i32
    %9 = vector.broadcast %c2_i32_0 : i32 to vector<15x8xi32>
    %10 = arith.muli %8, %9 : vector<15x8xi32>
    %11 = arith.cmpi eq, %7, %10 : vector<15x8xi32>
    %12 = arith.extui %11 : vector<15x8xi1> to vector<15x8xi32>
    %13 = arith.sitofp %12 : vector<15x8xi32> to vector<15x8xf32>
    %14 = tpu.iota {dimensions = array<i32: 0>} : vector<4x13xi32>
    %15 = tpu.iota {dimensions = array<i32: 1>} : vector<4x13xi32>
    %c4_i32 = arith.constant 4 : i32
    %16 = vector.broadcast %c4_i32 : i32 to vector<4x13xi32>
    %17 = arith.muli %14, %16 : vector<4x13xi32>
    %18 = arith.cmpi eq, %15, %17 : vector<4x13xi32>
    %19 = arith.extui %18 : vector<4x13xi1> to vector<4x13xi32>
    %20 = arith.sitofp %19 : vector<4x13xi32> to vector<4x13xf32>
    %21 = tpu.iota {dimensions = array<i32: 0>} : vector<13x4xi32>
    %22 = tpu.iota {dimensions = array<i32: 1>} : vector<13x4xi32>
    %c4_i32_1 = arith.constant 4 : i32
    %23 = vector.broadcast %c4_i32_1 : i32 to vector<13x4xi32>
    %24 = arith.muli %22, %23 : vector<13x4xi32>
    %25 = arith.cmpi eq, %21, %24 : vector<13x4xi32>
    %26 = arith.extui %25 : vector<13x4xi1> to vector<13x4xi32>
    %27 = arith.sitofp %26 : vector<13x4xi32> to vector<13x4xf32>
    %c0 = arith.constant 0 : index
    %28 = memref.load %arg2[%c0] : memref<16xf32, #tpu.memory_space<smem>>
    %c0_2 = arith.constant 0 : index
    %c0_3 = arith.constant 0 : index
    %c0_4 = arith.constant 0 : index
    %c0_5 = arith.constant 0 : index
    %29 = vector.load %arg1[%c0_2, %c0_3, %c0_4, %c0_5] : memref<1x16x16x16xf32, #tpu.memory_space<vmem>>, vector<1x1x16x16xf32>
    %30 = vector.shape_cast %29 : vector<1x1x16x16xf32> to vector<16x16xf32>
    %31 = vector.broadcast %28 : f32 to vector<16x16xf32>
    %32 = arith.mulf %31, %30 : vector<16x16xf32>
    %c1 = arith.constant 1 : index
    %33 = memref.load %arg2[%c1] : memref<16xf32, #tpu.memory_space<smem>>
    %c0_6 = arith.constant 0 : index
    %c1_7 = arith.constant 1 : index
    %c0_8 = arith.constant 0 : index
    %c0_9 = arith.constant 0 : index
    %34 = vector.load %arg1[%c0_6, %c1_7, %c0_8, %c0_9] : memref<1x16x16x16xf32, #tpu.memory_space<vmem>>, vector<1x1x16x16xf32>
    %35 = vector.shape_cast %34 : vector<1x1x16x16xf32> to vector<16x16xf32>
    %36 = vector.broadcast %33 : f32 to vector<16x16xf32>
    %37 = arith.mulf %36, %35 : vector<16x16xf32>
    %38 = arith.addf %32, %37 : vector<16x16xf32>
    %c2 = arith.constant 2 : index
    %39 = memref.load %arg2[%c2] : memref<16xf32, #tpu.memory_space<smem>>
    %c0_10 = arith.constant 0 : index
    %c2_11 = arith.constant 2 : index
    %c0_12 = arith.constant 0 : index
    %c0_13 = arith.constant 0 : index
    %40 = vector.load %arg1[%c0_10, %c2_11, %c0_12, %c0_13] : memref<1x16x16x16xf32, #tpu.memory_space<vmem>>, vector<1x1x16x16xf32>
    %41 = vector.shape_cast %40 : vector<1x1x16x16xf32> to vector<16x16xf32>
    %42 = vector.broadcast %39 : f32 to vector<16x16xf32>
    %43 = arith.mulf %42, %41 : vector<16x16xf32>
    %44 = arith.addf %38, %43 : vector<16x16xf32>
    %c3 = arith.constant 3 : index
    %45 = memref.load %arg2[%c3] : memref<16xf32, #tpu.memory_space<smem>>
    %c0_14 = arith.constant 0 : index
    %c3_15 = arith.constant 3 : index
    %c0_16 = arith.constant 0 : index
    %c0_17 = arith.constant 0 : index
    %46 = vector.load %arg1[%c0_14, %c3_15, %c0_16, %c0_17] : memref<1x16x16x16xf32, #tpu.memory_space<vmem>>, vector<1x1x16x16xf32>
    %47 = vector.shape_cast %46 : vector<1x1x16x16xf32> to vector<16x16xf32>
    %48 = vector.broadcast %45 : f32 to vector<16x16xf32>
    %49 = arith.mulf %48, %47 : vector<16x16xf32>
    %50 = arith.addf %44, %49 : vector<16x16xf32>
    %c4 = arith.constant 4 : index
    %51 = memref.load %arg2[%c4] : memref<16xf32, #tpu.memory_space<smem>>
    %c0_18 = arith.constant 0 : index
    %c4_19 = arith.constant 4 : index
    %c0_20 = arith.constant 0 : index
    %c0_21 = arith.constant 0 : index
    %52 = vector.load %arg1[%c0_18, %c4_19, %c0_20, %c0_21] : memref<1x16x16x16xf32, #tpu.memory_space<vmem>>, vector<1x1x16x16xf32>
    %53 = vector.shape_cast %52 : vector<1x1x16x16xf32> to vector<16x16xf32>
    %54 = vector.broadcast %51 : f32 to vector<16x16xf32>
    %55 = arith.mulf %54, %53 : vector<16x16xf32>
    %56 = arith.addf %50, %55 : vector<16x16xf32>
    %c5 = arith.constant 5 : index
    %57 = memref.load %arg2[%c5] : memref<16xf32, #tpu.memory_space<smem>>
    %c0_22 = arith.constant 0 : index
    %c5_23 = arith.constant 5 : index
    %c0_24 = arith.constant 0 : index
    %c0_25 = arith.constant 0 : index
    %58 = vector.load %arg1[%c0_22, %c5_23, %c0_24, %c0_25] : memref<1x16x16x16xf32, #tpu.memory_space<vmem>>, vector<1x1x16x16xf32>
    %59 = vector.shape_cast %58 : vector<1x1x16x16xf32> to vector<16x16xf32>
    %60 = vector.broadcast %57 : f32 to vector<16x16xf32>
    %61 = arith.mulf %60, %59 : vector<16x16xf32>
    %62 = arith.addf %56, %61 : vector<16x16xf32>
    %c6 = arith.constant 6 : index
    %63 = memref.load %arg2[%c6] : memref<16xf32, #tpu.memory_space<smem>>
    %c0_26 = arith.constant 0 : index
    %c6_27 = arith.constant 6 : index
    %c0_28 = arith.constant 0 : index
    %c0_29 = arith.constant 0 : index
    %64 = vector.load %arg1[%c0_26, %c6_27, %c0_28, %c0_29] : memref<1x16x16x16xf32, #tpu.memory_space<vmem>>, vector<1x1x16x16xf32>
    %65 = vector.shape_cast %64 : vector<1x1x16x16xf32> to vector<16x16xf32>
    %66 = vector.broadcast %63 : f32 to vector<16x16xf32>
    %67 = arith.mulf %66, %65 : vector<16x16xf32>
    %68 = arith.addf %62, %67 : vector<16x16xf32>
    %c7 = arith.constant 7 : index
    %69 = memref.load %arg2[%c7] : memref<16xf32, #tpu.memory_space<smem>>
    %c0_30 = arith.constant 0 : index
    %c7_31 = arith.constant 7 : index
    %c0_32 = arith.constant 0 : index
    %c0_33 = arith.constant 0 : index
    %70 = vector.load %arg1[%c0_30, %c7_31, %c0_32, %c0_33] : memref<1x16x16x16xf32, #tpu.memory_space<vmem>>, vector<1x1x16x16xf32>
    %71 = vector.shape_cast %70 : vector<1x1x16x16xf32> to vector<16x16xf32>
    %72 = vector.broadcast %69 : f32 to vector<16x16xf32>
    %73 = arith.mulf %72, %71 : vector<16x16xf32>
    %74 = arith.addf %68, %73 : vector<16x16xf32>
    %c8 = arith.constant 8 : index
    %75 = memref.load %arg2[%c8] : memref<16xf32, #tpu.memory_space<smem>>
    %c0_34 = arith.constant 0 : index
    %c8_35 = arith.constant 8 : index
    %c0_36 = arith.constant 0 : index
    %c0_37 = arith.constant 0 : index
    %76 = vector.load %arg1[%c0_34, %c8_35, %c0_36, %c0_37] : memref<1x16x16x16xf32, #tpu.memory_space<vmem>>, vector<1x1x16x16xf32>
    %77 = vector.shape_cast %76 : vector<1x1x16x16xf32> to vector<16x16xf32>
    %78 = vector.broadcast %75 : f32 to vector<16x16xf32>
    %79 = arith.mulf %78, %77 : vector<16x16xf32>
    %80 = arith.addf %74, %79 : vector<16x16xf32>
    %c9 = arith.constant 9 : index
    %81 = memref.load %arg2[%c9] : memref<16xf32, #tpu.memory_space<smem>>
    %c0_38 = arith.constant 0 : index
    %c9_39 = arith.constant 9 : index
    %c0_40 = arith.constant 0 : index
    %c0_41 = arith.constant 0 : index
    %82 = vector.load %arg1[%c0_38, %c9_39, %c0_40, %c0_41] : memref<1x16x16x16xf32, #tpu.memory_space<vmem>>, vector<1x1x16x16xf32>
    %83 = vector.shape_cast %82 : vector<1x1x16x16xf32> to vector<16x16xf32>
    %84 = vector.broadcast %81 : f32 to vector<16x16xf32>
    %85 = arith.mulf %84, %83 : vector<16x16xf32>
    %86 = arith.addf %80, %85 : vector<16x16xf32>
    %c10 = arith.constant 10 : index
    %87 = memref.load %arg2[%c10] : memref<16xf32, #tpu.memory_space<smem>>
    %c0_42 = arith.constant 0 : index
    %c10_43 = arith.constant 10 : index
    %c0_44 = arith.constant 0 : index
    %c0_45 = arith.constant 0 : index
    %88 = vector.load %arg1[%c0_42, %c10_43, %c0_44, %c0_45] : memref<1x16x16x16xf32, #tpu.memory_space<vmem>>, vector<1x1x16x16xf32>
    %89 = vector.shape_cast %88 : vector<1x1x16x16xf32> to vector<16x16xf32>
    %90 = vector.broadcast %87 : f32 to vector<16x16xf32>
    %91 = arith.mulf %90, %89 : vector<16x16xf32>
    %92 = arith.addf %86, %91 : vector<16x16xf32>
    %c11 = arith.constant 11 : index
    %93 = memref.load %arg2[%c11] : memref<16xf32, #tpu.memory_space<smem>>
    %c0_46 = arith.constant 0 : index
    %c11_47 = arith.constant 11 : index
    %c0_48 = arith.constant 0 : index
    %c0_49 = arith.constant 0 : index
    %94 = vector.load %arg1[%c0_46, %c11_47, %c0_48, %c0_49] : memref<1x16x16x16xf32, #tpu.memory_space<vmem>>, vector<1x1x16x16xf32>
    %95 = vector.shape_cast %94 : vector<1x1x16x16xf32> to vector<16x16xf32>
    %96 = vector.broadcast %93 : f32 to vector<16x16xf32>
    %97 = arith.mulf %96, %95 : vector<16x16xf32>
    %98 = arith.addf %92, %97 : vector<16x16xf32>
    %c12 = arith.constant 12 : index
    %99 = memref.load %arg2[%c12] : memref<16xf32, #tpu.memory_space<smem>>
    %c0_50 = arith.constant 0 : index
    %c12_51 = arith.constant 12 : index
    %c0_52 = arith.constant 0 : index
    %c0_53 = arith.constant 0 : index
    %100 = vector.load %arg1[%c0_50, %c12_51, %c0_52, %c0_53] : memref<1x16x16x16xf32, #tpu.memory_space<vmem>>, vector<1x1x16x16xf32>
    %101 = vector.shape_cast %100 : vector<1x1x16x16xf32> to vector<16x16xf32>
    %102 = vector.broadcast %99 : f32 to vector<16x16xf32>
    %103 = arith.mulf %102, %101 : vector<16x16xf32>
    %104 = arith.addf %98, %103 : vector<16x16xf32>
    %c13 = arith.constant 13 : index
    %105 = memref.load %arg2[%c13] : memref<16xf32, #tpu.memory_space<smem>>
    %c0_54 = arith.constant 0 : index
    %c13_55 = arith.constant 13 : index
    %c0_56 = arith.constant 0 : index
    %c0_57 = arith.constant 0 : index
    %106 = vector.load %arg1[%c0_54, %c13_55, %c0_56, %c0_57] : memref<1x16x16x16xf32, #tpu.memory_space<vmem>>, vector<1x1x16x16xf32>
    %107 = vector.shape_cast %106 : vector<1x1x16x16xf32> to vector<16x16xf32>
    %108 = vector.broadcast %105 : f32 to vector<16x16xf32>
    %109 = arith.mulf %108, %107 : vector<16x16xf32>
    %110 = arith.addf %104, %109 : vector<16x16xf32>
    %c14 = arith.constant 14 : index
    %111 = memref.load %arg2[%c14] : memref<16xf32, #tpu.memory_space<smem>>
    %c0_58 = arith.constant 0 : index
    %c14_59 = arith.constant 14 : index
    %c0_60 = arith.constant 0 : index
    %c0_61 = arith.constant 0 : index
    %112 = vector.load %arg1[%c0_58, %c14_59, %c0_60, %c0_61] : memref<1x16x16x16xf32, #tpu.memory_space<vmem>>, vector<1x1x16x16xf32>
    %113 = vector.shape_cast %112 : vector<1x1x16x16xf32> to vector<16x16xf32>
    %114 = vector.broadcast %111 : f32 to vector<16x16xf32>
    %115 = arith.mulf %114, %113 : vector<16x16xf32>
    %116 = arith.addf %110, %115 : vector<16x16xf32>
    %c15 = arith.constant 15 : index
    %117 = memref.load %arg2[%c15] : memref<16xf32, #tpu.memory_space<smem>>
    %c0_62 = arith.constant 0 : index
    %c15_63 = arith.constant 15 : index
    %c0_64 = arith.constant 0 : index
    %c0_65 = arith.constant 0 : index
    %118 = vector.load %arg1[%c0_62, %c15_63, %c0_64, %c0_65] : memref<1x16x16x16xf32, #tpu.memory_space<vmem>>, vector<1x1x16x16xf32>
    %119 = vector.shape_cast %118 : vector<1x1x16x16xf32> to vector<16x16xf32>
    %120 = vector.broadcast %117 : f32 to vector<16x16xf32>
    %121 = arith.mulf %120, %119 : vector<16x16xf32>
    %122 = arith.addf %116, %121 : vector<16x16xf32>
    %c0_66 = arith.constant 0 : index
    %123 = memref.load %arg3[%c0_66] : memref<1xf32, #tpu.memory_space<smem>>
    %124 = vector.broadcast %123 : f32 to vector<16x16xf32>
    %125 = arith.addf %122, %124 : vector<16x16xf32>
    %cst = arith.constant 5.000000e-01 : f32
    %126 = vector.broadcast %cst : f32 to vector<16x16xf32>
    %127 = arith.mulf %126, %125 : vector<16x16xf32>
    %128 = math.tanh %127 : vector<16x16xf32>
    %cst_67 = arith.constant 1.000000e+00 : f32
    %129 = vector.broadcast %cst_67 : f32 to vector<16x16xf32>
    %130 = arith.addf %128, %129 : vector<16x16xf32>
    %cst_68 = arith.constant 5.000000e-01 : f32
    %131 = vector.broadcast %cst_68 : f32 to vector<16x16xf32>
    %132 = arith.mulf %131, %130 : vector<16x16xf32>
    %c0_69 = arith.constant 0 : index
    %c0_70 = arith.constant 0 : index
    %c0_71 = arith.constant 0 : index
    %c0_72 = arith.constant 0 : index
    %133 = vector.load %arg4[%c0_69, %c0_70, %c0_71, %c0_72] : memref<1x1x16x16xf32, #tpu.memory_space<vmem>>, vector<1x1x16x16xf32>
    %134 = vector.shape_cast %133 : vector<1x1x16x16xf32> to vector<16x16xf32>
    %135 = vector.shape_cast %132 : vector<16x16xf32> to vector<1x1x16x16xf32>
    tpu.vector_store %arg4[%c0_69, %c0_70, %c0_71, %c0_72], %135 {strides = array<i32>} : memref<1x1x16x16xf32, #tpu.memory_space<vmem>>, vector<1x1x16x16xf32>,
    %136 = vector.extract_strided_slice %132 {offsets = [0, 0], sizes = [15, 16], strides = [1, 1]} : vector<16x16xf32> to vector<15x16xf32>
    %137 = vector.extract_strided_slice %132 {offsets = [1, 0], sizes = [15, 16], strides = [1, 1]} : vector<16x16xf32> to vector<15x16xf32>
    %138 = arith.maximumf %136, %137 : vector<15x16xf32>
    %cst_73 = arith.constant dense<0.000000e+00> : vector<8x16xf32>
    %139 = tpu.matmul %6, %138, %cst_73 {dimension_numbers = #tpu.dot_dimension_numbers<[1], [0], [0], [1], [0, 0, 1, 1], [], []>, precision = #tpu.contract_precision<fp32>} : vector<8x15xf32>, vector<15x16xf32>, vector<8x16xf32> -> vector<8x16xf32>
    %140 = vector.extract_strided_slice %139 {offsets = [0, 0], sizes = [8, 15], strides = [1, 1]} : vector<8x16xf32> to vector<8x15xf32>
    %141 = vector.extract_strided_slice %139 {offsets = [0, 1], sizes = [8, 15], strides = [1, 1]} : vector<8x16xf32> to vector<8x15xf32>
    %142 = arith.maximumf %140, %141 : vector<8x15xf32>
    %cst_74 = arith.constant dense<0.000000e+00> : vector<8x8xf32>
    %143 = tpu.matmul %142, %13, %cst_74 {dimension_numbers = #tpu.dot_dimension_numbers<[1], [0], [0], [1], [0, 0, 1, 1], [], []>, precision = #tpu.contract_precision<fp32>} : vector<8x15xf32>, vector<15x8xf32>, vector<8x8xf32> -> vector<8x8xf32>
    %c0_75 = arith.constant 0 : index
    %c0_76 = arith.constant 0 : index
    %c0_77 = arith.constant 0 : index
    %c0_78 = arith.constant 0 : index
    %144 = vector.load %arg5[%c0_75, %c0_76, %c0_77, %c0_78] : memref<1x1x8x8xf32, #tpu.memory_space<vmem>>, vector<1x1x8x8xf32>
    %145 = vector.shape_cast %144 : vector<1x1x8x8xf32> to vector<8x8xf32>
    %146 = vector.shape_cast %143 : vector<8x8xf32> to vector<1x1x8x8xf32>
    tpu.vector_store %arg5[%c0_75, %c0_76, %c0_77, %c0_78], %146 {strides = array<i32>} : memref<1x1x8x8xf32, #tpu.memory_space<vmem>>, vector<1x1x8x8xf32>,
    %147 = vector.extract_strided_slice %132 {offsets = [0, 0], sizes = [13, 16], strides = [1, 1]} : vector<16x16xf32> to vector<13x16xf32>
    %148 = vector.extract_strided_slice %132 {offsets = [1, 0], sizes = [13, 16], strides = [1, 1]} : vector<16x16xf32> to vector<13x16xf32>
    %149 = arith.maximumf %147, %148 : vector<13x16xf32>
    %150 = vector.extract_strided_slice %132 {offsets = [2, 0], sizes = [13, 16], strides = [1, 1]} : vector<16x16xf32> to vector<13x16xf32>
    %151 = arith.maximumf %149, %150 : vector<13x16xf32>
    %152 = vector.extract_strided_slice %132 {offsets = [3, 0], sizes = [13, 16], strides = [1, 1]} : vector<16x16xf32> to vector<13x16xf32>
    %153 = arith.maximumf %151, %152 : vector<13x16xf32>
    %cst_79 = arith.constant dense<0.000000e+00> : vector<4x16xf32>
    %154 = tpu.matmul %20, %153, %cst_79 {dimension_numbers = #tpu.dot_dimension_numbers<[1], [0], [0], [1], [0, 0, 1, 1], [], []>, precision = #tpu.contract_precision<fp32>} : vector<4x13xf32>, vector<13x16xf32>, vector<4x16xf32> -> vector<4x16xf32>
    %155 = vector.extract_strided_slice %154 {offsets = [0, 0], sizes = [4, 13], strides = [1, 1]} : vector<4x16xf32> to vector<4x13xf32>
    %156 = vector.extract_strided_slice %154 {offsets = [0, 1], sizes = [4, 13], strides = [1, 1]} : vector<4x16xf32> to vector<4x13xf32>
    %157 = arith.maximumf %155, %156 : vector<4x13xf32>
    %158 = vector.extract_strided_slice %154 {offsets = [0, 2], sizes = [4, 13], strides = [1, 1]} : vector<4x16xf32> to vector<4x13xf32>
    %159 = arith.maximumf %157, %158 : vector<4x13xf32>
    %160 = vector.extract_strided_slice %154 {offsets = [0, 3], sizes = [4, 13], strides = [1, 1]} : vector<4x16xf32> to vector<4x13xf32>
    %161 = arith.maximumf %159, %160 : vector<4x13xf32>
    %cst_80 = arith.constant dense<0.000000e+00> : vector<4x4xf32>
    %162 = tpu.matmul %161, %27, %cst_80 {dimension_numbers = #tpu.dot_dimension_numbers<[1], [0], [0], [1], [0, 0, 1, 1], [], []>, precision = #tpu.contract_precision<fp32>} : vector<4x13xf32>, vector<13x4xf32>, vector<4x4xf32> -> vector<4x4xf32>
    %c0_81 = arith.constant 0 : index
    %c0_82 = arith.constant 0 : index
    %c0_83 = arith.constant 0 : index
    %c0_84 = arith.constant 0 : index
    %163 = vector.load %arg6[%c0_81, %c0_82, %c0_83, %c0_84] : memref<1x1x4x4xf32, #tpu.memory_space<vmem>>, vector<1x1x4x4xf32>
    %164 = vector.shape_cast %163 : vector<1x1x4x4xf32> to vector<4x4xf32>
    %165 = vector.shape_cast %162 : vector<4x4xf32> to vector<1x1x4x4xf32>
    tpu.vector_store %arg6[%c0_81, %c0_82, %c0_83, %c0_84], %165 {strides = array<i32>} : memref<1x1x4x4xf32, #tpu.memory_space<vmem>>, vector<1x1x4x4xf32>,
    return
  }
  func.func @transform_0(%arg0: i32) -> (i32, i32, i32, i32) {
    %c0_i32 = arith.constant 0 : i32
    %c0_i32_0 = arith.constant 0 : i32
    %c0_i32_1 = arith.constant 0 : i32
    %c0_i32_2 = arith.constant 0 : i32
    return %arg0, %c0_i32, %c0_i32_0, %c0_i32_1 : i32, i32, i32, i32
  }
  func.func @transform_1(%arg0: i32) -> i32 {
    %c0_i32 = arith.constant 0 : i32
    %c0_i32_0 = arith.constant 0 : i32
    return %c0_i32 : i32
  }
  func.func @transform_2(%arg0: i32) -> i32 {
    %c0_i32 = arith.constant 0 : i32
    %c0_i32_0 = arith.constant 0 : i32
    return %c0_i32 : i32
  }
  func.func @transform_3(%arg0: i32) -> (i32, i32, i32, i32) {
    %c0_i32 = arith.constant 0 : i32
    %c0_i32_0 = arith.constant 0 : i32
    %c0_i32_1 = arith.constant 0 : i32
    %c0_i32_2 = arith.constant 0 : i32
    return %arg0, %c0_i32, %c0_i32_0, %c0_i32_1 : i32, i32, i32, i32
  }
  func.func @transform_4(%arg0: i32) -> (i32, i32, i32, i32) {
    %c0_i32 = arith.constant 0 : i32
    %c0_i32_0 = arith.constant 0 : i32
    %c0_i32_1 = arith.constant 0 : i32
    %c0_i32_2 = arith.constant 0 : i32
    return %arg0, %c0_i32, %c0_i32_0, %c0_i32_1 : i32, i32, i32, i32
  }
  func.func @transform_5(%arg0: i32) -> (i32, i32, i32, i32) {
    %c0_i32 = arith.constant 0 : i32
    %c0_i32_0 = arith.constant 0 : i32
    %c0_i32_1 = arith.constant 0 : i32
    %c0_i32_2 = arith.constant 0 : i32
    return %arg0, %c0_i32, %c0_i32_0, %c0_i32_1 : i32, i32, i32, i32
  }
}

</mosaic_0001>

<bundles_post_ra>
// kernel: tpu_custom_call.1
= control target key start
LH: loop header
LB: loop body
LE: loop exit
PB: predicated region body
PF: predicated region fallthrough
CT: control target
= control target key end

     0   :  { %s3818_s0 = inlined_call_operand.hbm [shape: f32[2,16,16,16], index: 0, kind: input, shape index: {}]   ;;  %s3819_s1 = inlined_call_operand.vmem [shape: f32[16], index: 1, kind: input, shape index: {}]   ;;  %s3820_s2 = inlined_call_operand.<no memory space> [shape: f32[1], index: 2, kind: input, shape index: {}]   ;;  %s3821_s3 = inlined_call_operand.hbm [shape: f32[2,1,16,16], index: 3, kind: output, shape index: {0}]   ;;  %s3822_s4 = inlined_call_operand.hbm [shape: f32[2,1,8,8], index: 4, kind: output, shape index: {1}]   ;;  %s3823_s5 = inlined_call_operand.hbm [shape: f32[2,1,4,4], index: 5, kind: output, shape index: {2}]  }
   0x1   :  { %11 = sst [smem:[#allocation2]] %s3820_s2 }
   0x2   :  { %12 = vsyncpa [#allocation4], 0 }
   0x3   :  { %14 = vsyncpa [#allocation4 + $0x1], 0 }
   0x4   :  { %15 = vsyncpa [#allocation6], 0 }
   0x5   :  { %16 = vsyncpa [#allocation5], 0 }
   0x6   :  { %18 = vsyncpa [#allocation5 + $0x1], 0 }
   0x7   :  { %19 = vsyncpa [#allocation10], 0 }
   0x8   :  { %21 = vsyncpa [#allocation10 + $0x1], 0  ;;  %s3324_s20 = smov 0   ;;  %s3326_s21 = smov 0  }
   0x9   :  { %s3328_s22 = smov 0   ;;  %s3330_s23 = smov 0  }
   0xa LB: > { %s3345_s2 = sadd.s32 4294967295, %s3273_s23   ;;  %s2565_s24 = sadd.s32 4294967294, %s3273_s23   ;;  %s3273_s23 = sphi %s3330_s23, %s3849_s23   ;;  %s3269_s22 = sphi %s3328_s22, %s3848_s22   ;;  %s3265_s21 = sphi %s3326_s21, %s3847_s21   ;;  %s3261_s20 = sphi %s3324_s20, %s3846_s20  }
   0xb   : > { %s3349_s25 = sadd.s32 1, %s3273_s23   ;;  %s34_s26 = sadd.s32 1, %s3269_s22 }
   0xc   : > { %s31_s27 = ssub.s32 %s3273_s23, %s3349_s25  ;;  %p41_p0 = scmp.ne.s32.totalorder %s3269_s22, %s3265_s21 }
   0xd   : > { %p32_p1 = scmp.eq.s32.totalorder %s31_s27, 0  ;;  %p42_p2 = scmp.eq.s32.totalorder %s3273_s23, 0 }
   0xe   : > { %p47_p3 = scmp.ne.s32.totalorder %s3265_s21, %s3261_s20  ;;  %p3825_p4 = scmp.eq.s32.totalorder %s3345_s2, 0 }
   0xf   : > { %s3361_s28 = scalar_select %p32_p1, %s3269_s22, %s34_s26  }
  0x10   : > { %p3363_p5 = por %p42_p2, %p41_p0  ;;  %p3369_p6 = por %p3825_p4, %p47_p3 }
  0x11   : > { %p113_p7 = scmp.eq.s32.totalorder %s3345_s2, 1  ;;  %p119_p8 = scmp.eq.s32.totalorder %s2565_s24, 1 }
  0x12   : > { %s3828_s30 = scalar_select %p3369_p6, 1, 0 }
  0x13   : > { %p2566_p9 = scmp.ge.s32.totalorder %s3273_s23, 1  ;;  %p178_p10 = scmp.lt.s32.totalorder %s3273_s23, 3 }
  0x14   : > { %p3378_p11 = por %p113_p7, %p41_p0  ;;  %p3382_p12 = por %p119_p8, %p47_p3 }
  0x15   : > { %p3386_p13 = pnand %p2566_p9, %p178_p10  ;;  %s191_s11 = sshll.u32 %s3819_s1, 4  ;;  %s192_s11 = int_to_ptr.vmem [resolvable:$true] %s191_s11 }
  0x16   : > { %s3829_s6 = scalar_select %p3378_p11, 1, 0 }
  0x17   : > { %s3830_s7 = scalar_select %p3382_p12, 1, 0 }
  0x18   : > { %p3028_p1 = pneg %p3386_p13  ;;  %p3047_p2 = scmp.lt.s32.totalorder %s3273_s23, 2 }
  0x19   : > { %s205_s13 = sand.u32 1, %s3269_s22   ;;  %s3098_s16 = scalar_lea.vmem %s192_s11, 16 }
  0x1a   : > { %p3399_p7 = pnand %p3028_p1, %p3825_p4  ;;  %p3406_p3 = pnand %p3047_p2, %p3363_p5 }
  0x1b   : > { %s2569_s15 = sshll.u32 %s205_s13, 8  ;;  %p3099_p8 = scmp.ne.s32.totalorder %s192_s11, %s3098_s16 }
  0x1c   : > { %p3100_p9 = pneg %p3399_p7  ;;  %p3106_p12 = scmp.lt.s32.totalorder %s192_s11, %s192_s11 }
  0x1d   : > { %p3107_p11 = scmp.lt.s32.totalorder %s3098_s16, %s3098_s16 }
  0x1e   : > { %p3101_p10 = pnand %p3100_p9, %p3099_p8 }
  0x1f   : > { %p3108_p1 = por %p3107_p11, %p3106_p12 }
  0x20   : > { %p3102_p0 = pneg %p3101_p10 }
  0x22   : > { %p3109_p4 = pnand %p3108_p1, %p3102_p0 }
  0x24   : > { %3112 = shalt.err (!%p3109_p4)
}
  0x25   : > { %s3275_s17 = smov [#allocation7]   ;;  %s2656_s18 = sshll.u32 %s3273_s23, 12 }
  0x26   : > { %3031 = dma.vmem_to_smem (!%p3399_p7), %s192_s11, 16, %s3275_s17, [#allocation6]  }
  0x27   : > { %s209_s19 = scalar_lea.vmem [#allocation3], %s2569_s15  ;;  %s3418_s9 = scalar_lea.hbm %s3818_s0, %s2656_s18 }
  0x28   : > { %s216_s26 = sshll.u32 %s209_s19, 4  ;;  %s3422_s10 = scalar_lea.sflag [#allocation4], %s205_s13  ;;  %s3420_s26 = int_to_ptr.vmem [resolvable:$true] %s216_s26 }
  0x29   : > { %s3113_s12 = scalar_lea.hbm %s3418_s9, 4096  ;;  %p3115_p5 = pneg %p3406_p3 }
  0x2a   : > { %p3114_p4 = scmp.ne.s32.totalorder %s3418_s9, %s3113_s12  ;;  %s3118_s16 = scalar_lea.hbm %s3818_s0, 8192 }
  0x2b   : > { %p3119_p0 = scmp.lt.u32.totalorder %s3418_s9, %s3818_s0  ;;  %p3120_p2 = scmp.lt.u32.totalorder %s3118_s16, %s3113_s12 }
  0x2c   : > { %p3116_p11 = pnand %p3115_p5, %p3114_p4  ;;  %p3122_p8 = scmp.lt.u32.totalorder %s3113_s12, %s3418_s9 }
  0x2d   : > { %p3121_p7 = por %p3120_p2, %p3119_p0 }
  0x2e   : > { %p3117_p12 = pneg %p3116_p11 }
  0x2f   : > { %p3123_p9 = por %p3122_p8, %p3121_p7 }
  0x31   : > { %p3124_p10 = pnand %p3123_p9, %p3117_p12 }
  0x33   : > { %3127 = shalt.err (!%p3124_p10)
}
  0x34   : > { %s3128_s13 = scalar_lea.vmem %s3420_s26, 4096  ;;  %s3276_s19 = smov [#allocation3]  }
  0x35   : > { %p3129_p1 = scmp.ne.s32.totalorder %s3420_s26, %s3128_s13  ;;  %s3133_s27 = sshll.u32 %s3276_s19, 4  ;;  %s3134_s27 = int_to_ptr.vmem [resolvable:$false] %s3133_s27 }
  0x36   : > { %s3135_s29 = scalar_lea.vmem %s3134_s27, 8192  ;;  %p3136_p6 = scmp.lt.s32.totalorder %s3420_s26, %s3134_s27 }
  0x37   : > { %p3131_p4 = pnand %p3129_p1, %p3115_p5  ;;  %p3137_p0 = scmp.lt.s32.totalorder %s3135_s29, %s3128_s13 }
  0x39   : > { %p3132_p11 = pneg %p3131_p4  ;;  %p3138_p2 = por %p3137_p0, %p3136_p6 }
  0x3b   : > { %p3139_p7 = pnand %p3138_p2, %p3132_p11 }
  0x3d   : > { %3142 = shalt.err (!%p3139_p7)
}
  0x3e   : > { %s3277_s12 = smov 128   ;;  %s3278_s11 = smov 8  }
  0x3f   : > { %3035 = dma.hbm_to_vmem [thread:$0]  (!%p3406_p3), %s3418_s9, 4096, %s3420_s26, %s3422_s10, %s3277_s12, %s3277_s12, %s3278_s11  }
  0x40   : > { %228 = sbr.rel (%p3386_p13) target bundleno = 843 (0x34b), region = 32  ;;  %s3453_s15 = sand.u32 (!%p3386_p13), 1, %s3265_s21  }
  0x41   : > { %s2573_s16 = sshll.u32 (!%p3386_p13), %s3453_s15, 8  ;;  %s231_s17 = scalar_lea.sflag (!%p3386_p13), [#allocation4], %s3453_s15 }
  0x42   : > { %s3457_s18 = scalar_lea.vmem (!%p3386_p13), [#allocation3], %s2573_s16  ;;  %p3834_p6 = scmp.ne.s32.totalorder (!%p3386_p13), %s3828_s30, 0 }
  0x47   : > { %3244 = dma.done.wait (%p3834_p6), %s231_s17, 4096  }
  0x48   : > { %3246 = vsyncadd (%p3834_p6), %s231_s17, 4294963200  ;;  %p3835_p3 = scmp.eq.s32.totalorder %s3345_s2, 0 }
  0x4a   : > { %3248 = dma.done.wait (%p3835_p3), [#allocation6], 16   ;;  %p3836_p13 = pmov %p3835_p3 }
  0x4c   : > { %3250 = vsyncadd (%p3836_p13), [#allocation6], 4294967280 }
  0x4d   : > { %243 = sfence }
  0x4e   : > { %s303_s8 = sld [smem:[#allocation7]]  ;;  %v3279_v0 = vmov 0.0|0.0   ;;  %s2584_s14 = sld [smem:[#allocation7 + $0x1]]  ;;  %v304_v1 = vld [vmem:[%s3457_s18] sm:$0xff]  ;;  %v305_v2 = vld [vmem:[%s3457_s18 + $0x8] sm:$0xff]  ;;  %v2585_v3 = vld [vmem:[%s3457_s18 + $0x10] sm:$0xff] }
  0x4f   : > { %2898 = vmatprep.subr.bf16.mxu0 %v3279_v0  ;;  %s2587_s30 = sld [smem:[#allocation7 + $0x2]]  ;;  %2916 = vmatprep.subr.bf16.mxu1 %v3279_v0  ;;  %s3469_s26 = sld [smem:[#allocation7 + $0x3]]  ;;  %v2586_v4 = vld [vmem:[%s3457_s18 + $0x18] sm:$0xff]  ;;  %v2588_v5 = vld [vmem:[%s3457_s18 + $0x20] sm:$0xff]  ;;  %v2589_v6 = vld [vmem:[%s3457_s18 + $0x28] sm:$0xff]  ;;  %vm3280_vm0 = vmmov 0  }
  0x50   : > { %s3472_s9 = sld [smem:[#allocation7 + $0x4]]  ;;  %s3474_s10 = sld [smem:[#allocation7 + $0x5]]  ;;  %v3281_v8 = vmov 0.0   ;;  %v2591_v13 = vld [vmem:[%s3457_s18 + $0x30] sm:$0xff]  ;;  %v2592_v14 = vld [vmem:[%s3457_s18 + $0x38] sm:$0xff]  ;;  %v2594_v20 = vld [vmem:[%s3457_s18 + $0x40] sm:$0xff] }
  0x51   : > { %s3481_s13 = sld [smem:[#allocation7 + $0x6]]  ;;  %2734 = vmatprep.mubr.msk.f32.mxu0 %vm3280_vm0, %v3281_v8  ;;  %2776 = vmatprep.mubr.msk.f32.mxu1 %vm3280_vm0, %v3281_v8  ;;  %s3489_s19 = sld [smem:[#allocation7 + $0x7]]  ;;  %v2595_v21 = vld [vmem:[%s3457_s18 + $0x48] sm:$0xff]  ;;  %v2597_v27 = vld [vmem:[%s3457_s18 + $0x50] sm:$0xff]  ;;  %v2598_v28 = vld [vmem:[%s3457_s18 + $0x58] sm:$0xff]  ;;  %vm469_vm2 = vcmask 121856  }
  0x52   : > { %s3495_s27 = sld [smem:[#allocation7 + $0x8]]  ;;  %s3500_s29 = sld [smem:[#allocation7 + $0x9]]  ;;  %v2600_v34 = vld [vmem:[%s3457_s18 + $0x60] sm:$0xff]  ;;  %v2601_v35 = vld [vmem:[%s3457_s18 + $0x68] sm:$0xff]  ;;  %v2603_v41 = vld [vmem:[%s3457_s18 + $0x70] sm:$0xff]  ;;  %vm461_vm3 = vcmask 1046528  }
  0x53   : > { %s3505_s12 = sld [smem:[#allocation7 + $0xa]]  ;;  %v2604_v42 = vld [vmem:[%s3457_s18 + $0x78] sm:$0xff]  ;;  %s3510_s11 = sld [smem:[#allocation7 + $0xb]]  ;;  %v2606_v48 = vld [vmem:[%s3457_s18 + $0x80] sm:$0xff]  ;;  %v2607_v49 = vld [vmem:[%s3457_s18 + $0x88] sm:$0xff]  ;;  %vm1407_vm4 = vcmask 1045504  }
  0x54   : > { %v306_v7 = vstv %s303_s8  ;;  %v313_v11 = vstv %s2584_s14  ;;  %s3515_s16 = sld [smem:[#allocation7 + $0xc]]  ;;  %v2609_v55 = vld [vmem:[%s3457_s18 + $0x90] sm:$0xff]  ;;  %v2610_v56 = vld [vmem:[%s3457_s18 + $0x98] sm:$0xff]  ;;  %s3520_s17 = sld [smem:[#allocation7 + $0xd]]  ;;  %vm1415_vm5 = vcmask 1044480   ;;  %vm1423_vm7 = vcmask 105472  }
  0x55   : > { %v307_v9 = vmul.f32 %v306_v7, %v304_v1  ;;  %v308_v10 = vmul.f32 %v306_v7, %v305_v2  ;;  %v322_v12 = vstv %s2587_s30  ;;  %v314_v15 = vmul.f32 %v2585_v3, %v313_v11  ;;  %v2612_v62 = vld [vmem:[%s3457_s18 + $0xa0] sm:$0xff]  ;;  %v2613_v63 = vld [vmem:[%s3457_s18 + $0xa8] sm:$0xff]  ;;  %s3525_s8 = sld [smem:[#allocation7 + $0xe]]  ;;  %v2616_v7 = vld [vmem:[%s3457_s18 + $0xb8] sm:$0xff]  ;;  %s3530_s14 = sld [smem:[#allocation7 + $0xf]] }
  0x56   : > { %v315_v16 = vmul.f32 %v2586_v4, %v313_v11  ;;  %v323_v17 = vmul.f32 %v2588_v5, %v322_v12  ;;  %v324_v18 = vmul.f32 %v2589_v6, %v322_v12  ;;  %v331_v19 = vstv %s3469_s26  ;;  %v2615_v6 = vld [vmem:[%s3457_s18 + $0xb0] sm:$0xff]  ;;  %s444_s30 = sld [smem:[#allocation2]]  ;;  %s3284_s26 = smov 126  }
  0x57   : > { %v340_v22 = vstv %s3472_s9  ;;  %v316_v23 = vadd.f32 %v314_v15, %v307_v9  ;;  %v332_v25 = vmul.f32 %v2591_v13, %v331_v19  ;;  %v333_v26 = vmul.f32 %v2592_v14, %v331_v19  ;;  %v2618_v14 = vld [vmem:[%s3457_s18 + $0xc0] sm:$0xff]  ;;  %v2619_v15 = vld [vmem:[%s3457_s18 + $0xc8] sm:$0xff]  ;;  %s3285_s9 = smov 125   ;;  %p3843_p12 = scmp.ne.s32.totalorder %s3829_s6, 0 }
  0x58   : > { %v317_v24 = vadd.f32 %v315_v16, %v308_v10  ;;  %v349_v29 = vstv %s3474_s10  ;;  %v341_v32 = vmul.f32 %v2594_v20, %v340_v22  ;;  %v342_v33 = vmul.f32 %v2595_v21, %v340_v22  ;;  %v2621_v21 = vld [vmem:[%s3457_s18 + $0xd0] sm:$0xff]  ;;  %v2622_v22 = vld [vmem:[%s3457_s18 + $0xd8] sm:$0xff]  ;;  %s2575_s10 = sshll.u32 %s3453_s15, 4 }
  0x59   : > { %v325_v30 = vadd.f32 %v323_v17, %v316_v23  ;;  %v358_v36 = vstv %s3481_s13  ;;  %v350_v39 = vmul.f32 %v2597_v27, %v349_v29  ;;  %v351_v40 = vmul.f32 %v2598_v28, %v349_v29  ;;  %v2624_v28 = vld [vmem:[%s3457_s18 + $0xe0] sm:$0xff]  ;;  %v2625_v29 = vld [vmem:[%s3457_s18 + $0xe8] sm:$0xff]  ;;  %s261_s13 = scalar_lea.vmem [#allocation8], %s2575_s10 }
  0x5a   : > { %v326_v31 = vadd.f32 %v324_v18, %v317_v24  ;;  %v367_v43 = vstv %s3489_s19  ;;  %v359_v46 = vmul.f32 %v2600_v34, %v358_v36  ;;  %v360_v47 = vmul.f32 %v2601_v35, %v358_v36  ;;  %v2627_v35 = vld [vmem:[%s3457_s18 + $0xf0] sm:$0xff]  ;;  %v2628_v36 = vld [vmem:[%s3457_s18 + $0xf8] sm:$0xff]  ;;  %s3283_s18 = smov 127   ;;  %s2657_s19 = sshll.u32 %s3345_s2, 8 }
  0x5b   : > { %v334_v37 = vadd.f32 %v332_v25, %v325_v30  ;;  %v376_v50 = vstv %s3495_s27  ;;  %v368_v53 = vmul.f32 %v2603_v41, %v367_v43  ;;  %v369_v54 = vmul.f32 %v2604_v42, %v367_v43  ;;  %s2393_s27 = sshll.u32 %s261_s13, 4  ;;  %s3707_s27 = int_to_ptr.vmem [resolvable:$true] %s2393_s27 }
  0x5c   : > { %v335_v38 = vadd.f32 %v333_v26, %v326_v31  ;;  %v385_v57 = vstv %s3500_s29  ;;  %v377_v60 = vmul.f32 %v2606_v48, %v376_v50  ;;  %v378_v61 = vmul.f32 %v2607_v49, %v376_v50 }
  0x5d   : > { %v343_v44 = vadd.f32 %v341_v32, %v334_v37  ;;  %v394_v1 = vstv %s3505_s12  ;;  %v386_v4 = vmul.f32 %v2609_v55, %v385_v57  ;;  %v387_v5 = vmul.f32 %v2610_v56, %v385_v57 }
  0x5e   : > { %v344_v45 = vadd.f32 %v342_v33, %v335_v38  ;;  %v403_v9 = vstv %s3510_s11  ;;  %v395_v12 = vmul.f32 %v2612_v62, %v394_v1  ;;  %v396_v13 = vmul.f32 %v2613_v63, %v394_v1  ;;  %s3705_s11 = scalar_lea.hbm %s3821_s3, %s2657_s19 }
  0x5f   : > { %v352_v51 = vadd.f32 %v350_v39, %v343_v44  ;;  %v412_v16 = vstv %s3515_s16  ;;  %v404_v19 = vmul.f32 %v2615_v6, %v403_v9  ;;  %v405_v20 = vmul.f32 %v2616_v7, %v403_v9  ;;  %s2370_s16 = scalar_lea.sflag [#allocation5], %s3453_s15 }
  0x60   : > { %v353_v52 = vadd.f32 %v351_v40, %v344_v45  ;;  %v421_v23 = vstv %s3520_s17  ;;  %v413_v26 = vmul.f32 %v2618_v14, %v412_v16  ;;  %v414_v27 = vmul.f32 %v2619_v15, %v412_v16  ;;  %s3143_s17 = scalar_lea.vmem %s3707_s27, 256 }
  0x61   : > { %v361_v58 = vadd.f32 %v359_v46, %v352_v51  ;;  %v430_v30 = vstv %s3525_s8  ;;  %v422_v33 = vmul.f32 %v2621_v21, %v421_v23  ;;  %v423_v34 = vmul.f32 %v2622_v22, %v421_v23  ;;  %p3144_p5 = scmp.ne.s32.totalorder %s3707_s27, %s3143_s17  ;;  %s3286_s8 = smov [#allocation8]  }
  0x62   : > { %v362_v59 = vadd.f32 %v360_v47, %v353_v52  ;;  %v439_v37 = vstv %s3530_s14  ;;  %v431_v40 = vmul.f32 %v2624_v28, %v430_v30  ;;  %v432_v41 = vmul.f32 %v2625_v29, %v430_v30  ;;  %s3147_s14 = sshll.u32 %s3286_s8, 4  ;;  %s3148_s14 = int_to_ptr.vmem [resolvable:$false] %s3147_s14 }
  0x63   : > { %v370_v2 = vadd.f32 %v368_v53, %v361_v58  ;;  %v440_v44 = vmul.f32 %v2627_v35, %v439_v37  ;;  %v441_v45 = vmul.f32 %v2628_v36, %v439_v37  ;;  %v276_v46 = vlaneseq  ;;  %p3145_p8 = pnand %p3144_p5, %p3843_p12  ;;  %p3150_p10 = scmp.lt.s32.totalorder %s3707_s27, %s3148_s14 }
  0x64   : > { %v371_v3 = vadd.f32 %v369_v54, %v362_v59  ;;  %v445_v49 = vstv %s444_s30  ;;  %vm456_vm14 = vcmask 130048   ;;  %s3149_s30 = scalar_lea.vmem %s3148_s14, 512 }
  0x65   : > { %v379_v10 = vadd.f32 %v377_v60, %v370_v2  ;;  %v3544_v52 = vshrl.u32 %v276_v46, 7  ;;  %v3546_v57 = vand.u32 127, %v276_v46  ;;  %p3146_p9 = pneg %p3145_p8  ;;  %p3151_p1 = scmp.lt.s32.totalorder %s3149_s30, %s3143_s17 }
  0x66   : > { %v380_v11 = vadd.f32 %v378_v61, %v371_v3 }
  0x67   : > { %v388_v17 = vadd.f32 %v386_v4, %v379_v10  ;;  %v280_v58 = vmul.u32 2, %v3544_v52  ;;  %v292_v37 = vmul.u32 4, %v3544_v52  ;;  %p3152_p4 = por %p3151_p1, %p3150_p10 }
  0x68   : > { %v389_v18 = vadd.f32 %v387_v5, %v380_v11 }
  0x69   : > { %v397_v24 = vadd.f32 %v395_v12, %v388_v17  ;;  %vm281_vm1 = vcmp.eq.s32.totalorder %v3546_v57, %v280_v58  ;;  %vm293_vm6 = vcmp.eq.s32.totalorder %v3546_v57, %v292_v37  ;;  %p3153_p11 = pnand %p3152_p4, %p3146_p9 }
  0x6a   : > { %v398_v25 = vadd.f32 %v396_v13, %v389_v18  ;;  %v3551_v59 = vsel %vm281_vm1, 1.0, %v3281_v8 }
  0x6b   : > { %v406_v31 = vadd.f32 %v404_v19, %v397_v24  ;;  %v471_v60 = vsel %vm469_vm2, %v3551_v59, 0 }
  0x6c   : > { %v407_v32 = vadd.f32 %v405_v20, %v398_v25  ;;  %v544_v2 = vsub.f32 %v471_v60, %v471_v60 }
  0x6d   : > { %v415_v38 = vadd.f32 %v413_v26, %v406_v31 }
  0x6e   : > { %v416_v39 = vadd.f32 %v414_v27, %v407_v32  ;;  %v545_v7 = vand.u32 4294901760, %v544_v2 }
  0x6f   : > { %v424_v42 = vadd.f32 %v422_v33, %v415_v38 }
  0x70   : > { %v425_v43 = vadd.f32 %v423_v34, %v416_v39  ;;  %v546_v13 = vsub.f32 %v544_v2, %v545_v7 }
  0x71   : > { %v433_v47 = vadd.f32 %v431_v40, %v424_v42 }
  0x72   : > { %v434_v48 = vadd.f32 %v432_v41, %v425_v43  ;;  %v547_v19 = vand.u32 4294901760, %v546_v13  ;;  %v2581_v43 = vsel %vm293_vm6, 1.0, %v3281_v8 }
  0x73   : > { %v442_v50 = vadd.f32 %v440_v44, %v433_v47  ;;  %v1425_v46 = vsel %vm1423_vm7, %v2581_v43, 0 }
  0x74   : > { %v443_v51 = vadd.f32 %v441_v45, %v434_v48  ;;  %v1498_v47 = vsub.f32 %v1425_v46, %v1425_v46 }
  0x75   : > { %v446_v53 = vadd.f32 %v445_v49, %v442_v50 }
  0x76   : > { %v447_v54 = vadd.f32 %v445_v49, %v443_v51  ;;  %v1499_v50 = vand.u32 4294901760, %v1498_v47 }
  0x77   : > { %v448_v55 = vmul.f32 0.5, %v446_v53 }
  0x78   : > { %v449_v56 = vmul.f32 0.5, %v447_v54  ;;  %v1500_v54 = vsub.f32 %v1498_v47, %v1499_v50 }
  0x79   : > { %3094 = vtanh.f32 %v448_v55 }
  0x7a   : > { %3096 = vtanh.f32 %v449_v56  ;;  %v1501_v60 = vand.u32 4294901760, %v1500_v54 }
  0x83   : > { %v3095_v61 = vpop.eup %3094 }
  0x84   : > { %v3097_v62 = vpop.eup %3096  ;;  %v452_v63 = vadd.f32 1.0, %v3095_v61 }
  0x85   : > { %v453_v1 = vadd.f32 1.0, %v3097_v62 }
  0x86   : > { %v3555_v3 = vmul.f32 0.5, %v452_v63  ;;  %v284_v63 = vadd.s32 8, %v3544_v52 }
  0x87   : > { %v3557_v4 = vmul.f32 0.5, %v453_v1  ;;  %v285_v1 = vmul.u32 2, %v3546_v57 }
  0x88   : > { %v462_v5 = vrot.slane %v3555_v3, 1  ;;  %v1408_v29 = vrot.slane %v3555_v3, 2  ;;  %v1416_v32 = vrot.slane %v3555_v3, 3  ;;  %457 = vst.msk [vmem:[%s261_s13] sm:$0xff] %vm456_vm14, %v3555_v3 }
  0x89   : > { %v463_v6 = vrot.slane %v3557_v4, 1  ;;  %v1409_v28 = vrot.slane %v3557_v4, 2  ;;  %v1417_v33 = vrot.slane %v3557_v4, 3  ;;  %vm286_vm8 = vcmp.eq.s32.totalorder %v3544_v52, %v285_v1  ;;  %458 = vst.msk [vmem:[%s261_s13 + $0x8] sm:$0xff] %vm456_vm14, %v3557_v4 }
  0x8a   : > { %vm287_vm9 = vcmp.eq.s32.totalorder %v284_v63, %v285_v1  ;;  %vm3624_vm10 = vmpackc.low %vm461_vm3, %vm286_vm8 }
  0x8b   : > { %v464_v9 = vsel %vm461_vm3, %v462_v5, %v463_v6  ;;  %v468_v10 = vmax.f32 %v3557_v4, %v463_v6  ;;  %v1410_v31 = vsel %vm1407_vm4, %v1408_v29, %v1409_v28  ;;  %v1418_v35 = vsel %vm1415_vm5, %v1416_v32, %v1417_v33 }
  0x8c   : > { %v467_v11 = vmax.f32 %v3555_v3, %v464_v9  ;;  %v2579_v5 = vsel %vm286_vm8, 1.0, %v3281_v8  ;;  %v2580_v6 = vsel %vm287_vm9, 1.0, %v3281_v8 }
  0x8d   : > { %v474_v12 = vsel %vm461_vm3, %v468_v10, 0  ;;  %v1414_v30 = vmax.f32 %v468_v10, %v1409_v28  ;;  %v944_v9 = vsel %vm461_vm3, %v2580_v6, 0  ;;  %v3282_v10 = vmov 1.0  }
  0x8e   : > { %v477_v14 = vand.u32 4294901760, %v467_v11  ;;  %v480_v15 = vand.u32 4294901760, %v474_v12  ;;  %v1413_v34 = vmax.f32 %v467_v11, %v1410_v31 }
  0x8f   : > { %v1422_v36 = vmax.f32 %v1414_v30, %v1417_v33 }
  0x90   : > { %v2899_v16 = vpack.c.bf16 %v480_v15, %v477_v14  ;;  %v555_v17 = vsub.f32 %v467_v11, %v477_v14  ;;  %v562_v18 = vsub.f32 %v474_v12, %v480_v15  ;;  %v1421_v38 = vmax.f32 %v1413_v34, %v1418_v35 }
  0x91   : > { %v1428_v39 = vsel %vm1415_vm5, %v1422_v36, 0  ;;  %v2917_v11 = vpack.c.bf16 %v2580_v6, %v3282_v10  ;;  %v1025_v12 = vsub.f32 %v2579_v5, %v2579_v5  ;;  %v1032_v14 = vsub.f32 %v944_v9, %v944_v9 }
  0x92   : > { %2900 = vmatpush3.bf16.msra.mxu0 %v2899_v16  ;;  %v556_v20 = vand.u32 4294901760, %v555_v17  ;;  %v563_v21 = vand.u32 4294901760, %v562_v18  ;;  %v2905_v27 = vpack.c.bf16 %v562_v18, %v555_v17  ;;  %v1431_v41 = vand.u32 4294901760, %v1421_v38 }
  0x93   : > { %2901 = vmatprep.subr.bf16.mxu0 %v3279_v0  ;;  %v1434_v42 = vand.u32 4294901760, %v1428_v39  ;;  %2919 = vmatpush3.bf16.msk.msra.mxu1 %vm3624_vm10, %v2917_v11 }
  0x94   : > { %v557_v22 = vsub.f32 %v555_v17, %v556_v20  ;;  %v564_v23 = vsub.f32 %v562_v18, %v563_v21  ;;  %v2911_v40 = vpack.c.bf16 %v563_v21, %v556_v20  ;;  %v1509_v44 = vsub.f32 %v1421_v38, %v1431_v41  ;;  %2920 = vmatprep.subr.bf16.mxu1 %v3279_v0 }
  0x95   : > { %2735 = vmatmul.mubr.f32.vlgmr.msra.gmra.mrb[0].mxu0 %v547_v19  ;;  %v1516_v45 = vsub.f32 %v1428_v39, %v1434_v42  ;;  %v2938_v55 = vpack.c.bf16 %v1434_v42, %v1431_v41 }
  0x96   : > { %v558_v24 = vand.u32 4294901760, %v557_v22  ;;  %v565_v25 = vand.u32 4294901760, %v564_v23  ;;  %2741 = vmatprep.mubr.msk.f32.mxu0 %vm3280_vm0, %v3281_v8  ;;  %v1510_v48 = vand.u32 4294901760, %v1509_v44 }
  0x97   : > { %v1517_v49 = vand.u32 4294901760, %v1516_v45  ;;  %v2944_v62 = vpack.c.bf16 %v1516_v45, %v1509_v44 }
  0x98   : > { %v2902_v26 = vpack.c.bf16 %v565_v25, %v558_v24  ;;  %v1511_v51 = vsub.f32 %v1509_v44, %v1510_v48  ;;  %v2924_v24 = vpack.c.bf16 %v1032_v14, %v1025_v12 }
  0x99   : > { %v1518_v53 = vsub.f32 %v1516_v45, %v1517_v49 }
  0x9a   : > { %2903 = vmatpush3.bf16.msra.mxu0 %v2902_v26  ;;  %v1512_v56 = vand.u32 4294901760, %v1511_v51 }
  0x9b   : > { %2904 = vmatprep.subr.bf16.mxu0 %v3279_v0  ;;  %v1519_v58 = vand.u32 4294901760, %v1518_v53 }
  0x9d   : > { %2742 = vmatmul.mubr.msk.f32.vlgmr.msra.gmra.mrb[0].mxu0 %vm469_vm2, %v3551_v59  ;;  %v2941_v61 = vpack.c.bf16 %v1519_v58, %v1512_v56 }
  0x9e   : > { %2906 = vmatpush3.bf16.msra.mxu0 %v2905_v27  ;;  %2748 = vmatprep.mubr.msk.f32.mxu0 %vm3280_vm0, %v3281_v8 }
  0x9f   : > { %2907 = vmatprep.subr.bf16.mxu0 %v3279_v0 }
  0xa5   : > { %2749 = vmatmul.mubr.f32.vlgmr.msra.gmra.mrb[0].mxu0 %v544_v2  ;;  %v296_v2 = vmul.u32 4, %v3546_v57  ;;  %v1026_v57 = vand.u32 4294901760, %v1025_v12 }
  0xa6   : > { %2909 = vmatpush3.bf16.msra.mxu0 %v2899_v16  ;;  %2755 = vmatprep.mubr.msk.f32.mxu0 %vm3280_vm0, %v3281_v8 }
  0xa7   : > { %2910 = vmatprep.subr.bf16.mxu0 %v3279_v0  ;;  %vm298_vm11 = vcmp.eq.s32.totalorder %v284_v63, %v296_v2  ;;  %v1027_v17 = vsub.f32 %v1025_v12, %v1026_v57  ;;  %vm3648_vm12 = vcmp.eq.s32.totalorder %v3544_v52, %v296_v2 }
  0xa8   : > { %v2583_v13 = vsel %vm298_vm11, 1.0, %v3281_v8  ;;  %v2582_v38 = vsel %vm3648_vm12, 1.0, %v3281_v8  ;;  %vm3668_vm13 = vmpackc.low %vm1415_vm5, %vm3648_vm12 }
  0xa9   : > { %v3632_v15 = vpack.c.bf16 %v2583_v13, %v3282_v10  ;;  %v1028_v21 = vand.u32 4294901760, %v1027_v17  ;;  %v1906_v37 = vsel %vm1415_vm5, %v2583_v13, 0 }
  0xaa   : > { %v1994_v39 = vsub.f32 %v1906_v37, %v1906_v37 }
  0xac   : > { %v1995_v45 = vand.u32 4294901760, %v1994_v39 }
  0xad   : > { %2756 = vmatmul.mubr.f32.vlgmr.msra.gmra.mrb[0].mxu0 %v545_v7 }
  0xae   : > { %2912 = vmatpush3.bf16.msra.mxu0 %v2911_v40  ;;  %2762 = vmatprep.mubr.msk.f32.mxu0 %vm3280_vm0, %v3281_v8  ;;  %v1987_v40 = vsub.f32 %v2582_v38, %v2582_v38 }
  0xaf   : > { %2913 = vmatprep.subr.bf16.mxu0 %v3279_v0 }
  0xb0   : > { %v1988_v44 = vand.u32 4294901760, %v1987_v40 }
  0xb2   : > { %v2970_v63 = vpack.c.bf16 %v1995_v45, %v1988_v44 }
  0xb5   : > { %2763 = vmatmul.mubr.msk.f32.vlgmr.msra.gmra.mrb[0].mxu0 %vm469_vm2, %v3551_v59 }
  0xb6   : > { %2915 = vmatpush3.bf16.msra.mxu0 %v2899_v16  ;;  %2769 = vmatprep.mubr.msk.f32.mxu0 %vm3280_vm0, %v3281_v8  ;;  %v1033_v16 = vand.u32 4294901760, %v1032_v14 }
  0xb7   : > { %2937 = vmatprep.subr.bf16.mxu0 %v3279_v0 }
  0xb8   : > { %v1034_v19 = vsub.f32 %v1032_v14, %v1033_v16  ;;  %v2931_v25 = vpack.c.bf16 %v1033_v16, %v1026_v57 }
  0xba   : > { %v1035_v22 = vand.u32 4294901760, %v1034_v19 }
  0xbc   : > { %v2921_v23 = vpack.c.bf16 %v1035_v22, %v1028_v21 }
  0xbd   : > { %2770 = vmatmul.mubr.msk.f32.vlgmr.msra.gmra.mrb[0].mxu0 %vm469_vm2, %v3551_v59  ;;  %v2950_v59 = vpack.c.bf16 %v1517_v49, %v1510_v48  ;;  %v1989_v49 = vsub.f32 %v1987_v40, %v1988_v44 }
  0xbe   : > { %2939 = vmatpush3.bf16.msra.mxu0 %v2938_v55  ;;  %2818 = vmatprep.mubr.msk.f32.mxu0 %vm3280_vm0, %v3281_v8 }
  0xbf   : > { %2940 = vmatprep.subr.bf16.mxu0 %v3279_v0 }
  0xc1   : > { %2819 = vmatmul.mubr.f32.vlgmr.msra.gmra.mrb[2].mxu0 %v1501_v60 }
  0xc2   : > { %2942 = vmatpush3.bf16.msra.mxu0 %v2941_v61  ;;  %2825 = vmatprep.mubr.msk.f32.mxu0 %vm3280_vm0, %v3281_v8 }
  0xc3   : > { %2943 = vmatprep.subr.bf16.mxu0 %v3279_v0 }
  0xc9   : > { %2826 = vmatmul.mubr.msk.f32.vlgmr.msra.gmra.mrb[2].mxu0 %vm1423_vm7, %v2581_v43 }
  0xca   : > { %2945 = vmatpush3.bf16.msra.mxu0 %v2944_v62  ;;  %2832 = vmatprep.mubr.msk.f32.mxu0 %vm3280_vm0, %v3281_v8 }
  0xcb   : > { %2946 = vmatprep.subr.bf16.mxu0 %v3279_v0 }
  0xd1   : > { %2833 = vmatmul.mubr.f32.vlgmr.msra.gmra.mrb[2].mxu0 %v1498_v47 }
  0xd2   : > { %2948 = vmatpush3.bf16.msra.mxu0 %v2938_v55  ;;  %2839 = vmatprep.mubr.msk.f32.mxu0 %vm3280_vm0, %v3281_v8 }
  0xd3   : > { %2949 = vmatprep.subr.bf16.mxu0 %v3279_v0 }
  0xd9   : > { %2840 = vmatmul.mubr.f32.vlgmr.msra.gmra.mrb[2].mxu0 %v1499_v50  ;;  %v1996_v50 = vsub.f32 %v1994_v39, %v1995_v45 }
  0xda   : > { %2951 = vmatpush3.bf16.msra.mxu0 %v2950_v59  ;;  %2846 = vmatprep.mubr.msk.f32.mxu0 %vm3280_vm0, %v3281_v8  ;;  %v2963_v59 = vpack.c.bf16 %v1994_v39, %v1987_v40 }
  0xdb   : > { %2952 = vmatprep.subr.bf16.mxu0 %v3279_v0  ;;  %v1997_v56 = vand.u32 4294901760, %v1996_v50 }
  0xe1   : > { %2847 = vmatmul.mubr.msk.f32.vlgmr.msra.gmra.mrb[2].mxu0 %vm1423_vm7, %v2581_v43 }
  0xe2   : > { %2954 = vmatpush3.bf16.msra.mxu0 %v2938_v55  ;;  %2853 = vmatprep.mubr.msk.f32.mxu0 %vm3280_vm0, %v3281_v8  ;;  %v1990_v55 = vand.u32 4294901760, %v1989_v49 }
  0xe4   : > { %v2960_v61 = vpack.c.bf16 %v1997_v56, %v1990_v55 }
  0xe9   : > { %2854 = vmatmul.mubr.msk.f32.vlgmr.msra.gmra.mrb[2].mxu0 %vm1423_vm7, %v2581_v43 }
 0x190   : > { %v931_v18 = vpop.f32.mrb[0].mxu0 }
 0x191   : > { %936 = vrot.lane.b32.xlu0 %v931_v18, %s3283_s18  ;;  %v2771_v20 = vpop.f32.mrb[1].mxu0 }
 0x1bc   : > { %v1885_v26 = vpop.f32.mrb[2].mxu0 }
 0x1bd   : > { %1894 = vrot.lane.b32.xlu1 %v1885_v26, %s3284_s26  ;;  %1890 = vrot.lane.b32.xlu0 %v1885_v26, %s3283_s18  ;;  %v2855_v27 = vpop.f32.mrb[3].mxu0 }
 0x1c1   : > { %1898 = vrot.lane.b32.xlu1 %v1885_v26, %s3285_s9 }
 0x203   : > { %v937_v28 = vpop.permute.xlu0 %936 }
 0x204   : > { %v939_v29 = vmax.f32 %v931_v18, %v937_v28 }
 0x206   : > { %v941_v30 = vsel %vm469_vm2, %v939_v29, 0 }
 0x207   : > { %v1013_v31 = vand.u32 4294901760, %v941_v30 }
 0x209   : > { %v1014_v32 = vsub.f32 %v941_v30, %v1013_v31 }
 0x20b   : > { %v1015_v33 = vand.u32 4294901760, %v1014_v32 }
 0x20d   : > { %v1016_v34 = vsub.f32 %v1014_v32, %v1015_v33 }
 0x20f   : > { %v1017_v35 = vand.u32 4294901760, %v1016_v34 }
 0x211   : > { %2777 = vmatmul.mubr.f32.vlgmr.msra.gmra.mrb[0].mxu1 %v1017_v35 }
 0x212   : > { %2922 = vmatpush3.bf16.msra.mxu1 %v2921_v23  ;;  %2783 = vmatprep.mubr.msk.f32.mxu1 %vm3280_vm0, %v3281_v8 }
 0x213   : > { %2923 = vmatprep.subr.bf16.mxu1 %v3279_v0 }
 0x219   : > { %2784 = vmatmul.mubr.f32.vlgmr.msra.gmra.mrb[0].mxu1 %v1013_v31 }
 0x21a   : > { %2925 = vmatpush3.bf16.msra.mxu1 %v2924_v24  ;;  %2790 = vmatprep.mubr.msk.f32.mxu1 %vm3280_vm0, %v3281_v8 }
 0x21b   : > { %2926 = vmatprep.subr.bf16.mxu1 %v3279_v0 }
 0x221   : > { %2791 = vmatmul.mubr.f32.vlgmr.msra.gmra.mrb[0].mxu1 %v1014_v32 }
 0x222   : > { %2929 = vmatpush3.bf16.msk.msra.mxu1 %vm3624_vm10, %v2917_v11  ;;  %2797 = vmatprep.mubr.msk.f32.mxu1 %vm3280_vm0, %v3281_v8 }
 0x223   : > { %2930 = vmatprep.subr.bf16.mxu1 %v3279_v0 }
 0x229   : > { %2798 = vmatmul.mubr.f32.vlgmr.msra.gmra.mrb[0].mxu1 %v1015_v33 }
 0x22a   : > { %2932 = vmatpush3.bf16.msra.mxu1 %v2931_v25  ;;  %2804 = vmatprep.mubr.msk.f32.mxu1 %vm3280_vm0, %v3281_v8 }
 0x22b   : > { %2933 = vmatprep.subr.bf16.mxu1 %v3279_v0 }
 0x22f   : > { %v1895_v41 = vpop.permute.xlu1 %1894  ;;  %v1891_v52 = vpop.permute.xlu0 %1890 }
 0x230   : > { %v1893_v42 = vmax.f32 %v1885_v26, %v1891_v52 }
 0x231   : > { %2805 = vmatmul.mubr.f32.vlgmr.msra.gmra.mrb[0].mxu1 %v1013_v31 }
 0x232   : > { %v1897_v43 = vmax.f32 %v1893_v42, %v1895_v41  ;;  %2936 = vmatpush3.bf16.msk.msra.mxu1 %vm3624_vm10, %v2917_v11  ;;  %2811 = vmatprep.mubr.msk.f32.mxu1 %vm3280_vm0, %v3281_v8 }
 0x233   : > { %v1899_v46 = vpop.permute.xlu1 %1898  ;;  %2955 = vmatprep.subr.bf16.mxu1 %v3279_v0 }
 0x234   : > { %v1901_v47 = vmax.f32 %v1897_v43, %v1899_v46 }
 0x236   : > { %v1903_v48 = vsel %vm1423_vm7, %v1901_v47, 0 }
 0x237   : > { %v1975_v51 = vand.u32 4294901760, %v1903_v48 }
 0x239   : > { %v1976_v54 = vsub.f32 %v1903_v48, %v1975_v51  ;;  %2812 = vmatmul.mubr.f32.vlgmr.msra.gmra.mrb[0].mxu1 %v1013_v31 }
 0x23a   : > { %2958 = vmatpush3.bf16.msk.msra.mxu1 %vm3668_vm13, %v3632_v15  ;;  %2860 = vmatprep.mubr.msk.f32.mxu1 %vm3280_vm0, %v3281_v8 }
 0x23b   : > { %v1977_v58 = vand.u32 4294901760, %v1976_v54  ;;  %2959 = vmatprep.subr.bf16.mxu1 %v3279_v0 }
 0x23d   : > { %v1978_v60 = vsub.f32 %v1976_v54, %v1977_v58 }
 0x23f   : > { %v1979_v62 = vand.u32 4294901760, %v1978_v60 }
 0x241   : > { %2861 = vmatmul.mubr.f32.vlgmr.msra.gmra.mrb[2].mxu1 %v1979_v62 }
 0x242   : > { %2961 = vmatpush3.bf16.msra.mxu1 %v2960_v61  ;;  %2867 = vmatprep.mubr.msk.f32.mxu1 %vm3280_vm0, %v3281_v8 }
 0x243   : > { %2962 = vmatprep.subr.bf16.mxu1 %v3279_v0 }
 0x249   : > { %2868 = vmatmul.mubr.f32.vlgmr.msra.gmra.mrb[2].mxu1 %v1975_v51 }
 0x24a   : > { %2964 = vmatpush3.bf16.msra.mxu1 %v2963_v59  ;;  %2874 = vmatprep.mubr.msk.f32.mxu1 %vm3280_vm0, %v3281_v8 }
 0x24b   : > { %2965 = vmatprep.subr.bf16.mxu1 %v3279_v0 }
 0x251   : > { %2875 = vmatmul.mubr.f32.vlgmr.msra.gmra.mrb[2].mxu1 %v1976_v54 }
 0x252   : > { %2968 = vmatpush3.bf16.msk.msra.mxu1 %vm3668_vm13, %v3632_v15  ;;  %2881 = vmatprep.mubr.msk.f32.mxu1 %vm3280_vm0, %v3281_v8 }
 0x253   : > { %2969 = vmatprep.subr.bf16.mxu1 %v3279_v0 }
 0x259   : > { %2882 = vmatmul.mubr.f32.vlgmr.msra.gmra.mrb[2].mxu1 %v1977_v58 }
 0x25a   : > { %2971 = vmatpush3.bf16.msra.mxu1 %v2970_v63  ;;  %2888 = vmatprep.mubr.msk.f32.mxu1 %vm3280_vm0, %v3281_v8 }
 0x25b   : > { %2972 = vmatprep.subr.bf16.mxu1 %v3279_v0 }
 0x261   : > { %2889 = vmatmul.mubr.f32.vlgmr.msra.gmra.mrb[2].mxu1 %v1975_v51 }
 0x262   : > { %2975 = vmatpush3.bf16.msk.msra.mxu1 %vm3668_vm13, %v3632_v15  ;;  %2895 = vmatprep.mubr.msk.f32.mxu1 %vm3280_vm0, %v3281_v8 }
 0x269   : > { %2896 = vmatmul.mubr.f32.vlgmr.msra.gmra.mrb[2].mxu1 %v1975_v51 }
 0x26a   : > { %3156 = shalt.err (!%p3153_p11)
}
 0x26b   : > { %s3157_s18 = scalar_lea.hbm %s3705_s11, 256  ;;  %s3161_s10 = scalar_lea.hbm %s3821_s3, 512 }
 0x26c   : > { %p3158_p0 = scmp.ne.s32.totalorder %s3705_s11, %s3157_s18  ;;  %p3162_p6 = scmp.lt.u32.totalorder %s3705_s11, %s3821_s3 }
 0x26d   : > { %p3163_p3 = scmp.lt.u32.totalorder %s3161_s10, %s3157_s18  ;;  %p3165_p5 = scmp.lt.u32.totalorder %s3157_s18, %s3705_s11 }
 0x26e   : > { %p3159_p2 = pnand %p3158_p0, %p3843_p12 }
 0x26f   : > { %p3164_p13 = por %p3163_p3, %p3162_p6 }
 0x270   : > { %p3160_p7 = pneg %p3159_p2 }
 0x271   : > { %p3166_p8 = por %p3165_p5, %p3164_p13 }
 0x273   : > { %p3167_p9 = pnand %p3166_p8, %p3160_p7 }
 0x275   : > { %3170 = shalt.err (!%p3167_p9)
}
 0x276   : > { %s3287_s29 = smov 128   ;;  %s3288_s12 = smov 8   ;;  %vm1405_vm15 = vcmask 64512  }
 0x277   : > { %3022 = dma.vmem_to_hbm [thread:$0]  (%p3843_p12), %s3707_s27, 256, %s3705_s11, %s2370_s16, %s3287_s29, %s3287_s29, %s3288_s12  }
 0x278   : > { %s2576_s17 = sshll.u32 %s3453_s15, 3  ;;  %s2374_s8 = sand.u32 1, %s3345_s2  }
 0x279   : > { %s2652_s14 = sshll.u32 %s3345_s2, 7  ;;  %s268_s30 = scalar_lea.vmem [#allocation9], %s2576_s17 }
 0x27a   : > { %s2409_s18 = sshll.u32 %s268_s30, 4  ;;  %s3739_s10 = scalar_lea.hbm %s3822_s4, %s2652_s14  ;;  %s3741_s18 = int_to_ptr.vmem [resolvable:$true] %s2409_s18 }
 0x27b   : > { %s3743_s27 = scalar_lea.sflag [#allocation10], %s2374_s8  ;;  %s3171_s11 = scalar_lea.vmem %s3741_s18, 128 }
 0x27c   : > { %p3172_p10 = scmp.ne.s32.totalorder %s3741_s18, %s3171_s11  ;;  %s3289_s16 = smov [#allocation9]  }
 0x27d   : > { %s3175_s13 = sshll.u32 %s3289_s16, 4  ;;  %s3176_s13 = int_to_ptr.vmem [resolvable:$false] %s3175_s13 }
 0x27e   : > { %p3173_p1 = pnand %p3172_p10, %p3843_p12  ;;  %s3177_s19 = scalar_lea.vmem %s3176_s13, 256 }
 0x27f   : > { %p3178_p11 = scmp.lt.s32.totalorder %s3741_s18, %s3176_s13  ;;  %p3179_p0 = scmp.lt.s32.totalorder %s3177_s19, %s3171_s11 }
 0x280   : > { %p3174_p4 = pneg %p3173_p1 }
 0x281   : > { %p3180_p2 = por %p3179_p0, %p3178_p11 }
 0x283   : > { %p3181_p7 = pnand %p3180_p2, %p3174_p4 }
 0x30c   : > { %v1401_v0 = vpop.f32.mrb[0].mxu1 }
 0x30d   : > { %1406 = vst.msk [vmem:[%s268_s30] sm:$0xff] %vm1405_vm15, %v1401_v0  ;;  %v2813_v8 = vpop.f32.mrb[1].mxu1 }
 0x30e   : > { %3184 = shalt.err (!%p3181_p7)
}
 0x30f   : > { %s3185_s29 = scalar_lea.hbm %s3739_s10, 128  ;;  %s3189_s8 = scalar_lea.hbm %s3822_s4, 256 }
 0x310   : > { %p3186_p6 = scmp.ne.s32.totalorder %s3739_s10, %s3185_s29  ;;  %p3190_p5 = scmp.lt.u32.totalorder %s3739_s10, %s3822_s4 }
 0x311   : > { %p3191_p8 = scmp.lt.u32.totalorder %s3189_s8, %s3185_s29  ;;  %p3193_p10 = scmp.lt.u32.totalorder %s3185_s29, %s3739_s10 }
 0x312   : > { %p3187_p3 = pnand %p3186_p6, %p3843_p12 }
 0x313   : > { %p3192_p9 = por %p3191_p8, %p3190_p5 }
 0x314   : > { %p3188_p13 = pneg %p3187_p3 }
 0x315   : > { %p3194_p1 = por %p3193_p10, %p3192_p9 }
 0x317   : > { %p3195_p4 = pnand %p3194_p1, %p3188_p13 }
 0x319   : > { %3198 = shalt.err (!%p3195_p4)
}
 0x31a   : > { %3023 = dma.vmem_to_hbm [thread:$0]  (%p3843_p12), %s3741_s18, 128, %s3739_s10, %s3743_s27   ;;  %vm2367_vm0 = vcmask 27648  }
 0x31b   : > { %s2577_s26 = sshll.u32 %s3453_s15, 2  ;;  %s2653_s16 = sshll.u32 %s3345_s2, 6 }
 0x31c   : > { %s275_s9 = scalar_lea.vmem [#allocation11], %s2577_s26  ;;  %s3774_s29 = scalar_lea.hbm %s3823_s5, %s2653_s16 }
 0x31d   : > { %s2422_s11 = sshll.u32 %s275_s9, 4  ;;  %s3290_s2 = smov [#allocation11]   ;;  %s3769_s11 = int_to_ptr.vmem [resolvable:$true] %s2422_s11 }
 0x31e   : > { %s3199_s12 = scalar_lea.vmem %s3769_s11, 64  ;;  %s3203_s15 = sshll.u32 %s3290_s2, 4  ;;  %s3204_s15 = int_to_ptr.vmem [resolvable:$false] %s3203_s15 }
 0x31f   : > { %p3200_p11 = scmp.ne.s32.totalorder %s3769_s11, %s3199_s12  ;;  %s3205_s18 = scalar_lea.vmem %s3204_s15, 128 }
 0x320   : > { %p3206_p7 = scmp.lt.s32.totalorder %s3769_s11, %s3204_s15  ;;  %p3207_p6 = scmp.lt.s32.totalorder %s3205_s18, %s3199_s12 }
 0x321   : > { %p3201_p0 = pnand %p3200_p11, %p3843_p12 }
 0x322   : > { %p3208_p3 = por %p3207_p6, %p3206_p7 }
 0x323   : > { %p3202_p2 = pneg %p3201_p0 }
 0x325   : > { %p3209_p13 = pnand %p3208_p3, %p3202_p2 }
 0x33c   : > { %v2363_v3 = vpop.f32.mrb[2].mxu1 }
 0x33d   : > { %2368 = vst.msk [vmem:[%s275_s9] sm:$0xf] %vm2367_vm0, %v2363_v3  ;;  %v2897_v4 = vpop.f32.mrb[3].mxu1 }
 0x33e   : > { %3212 = shalt.err (!%p3209_p13)
}
 0x33f   : > { %s3213_s10 = scalar_lea.hbm %s3774_s29, 64  ;;  %s3217_s14 = scalar_lea.hbm %s3823_s5, 128 }
 0x340   : > { %p3214_p5 = scmp.ne.s32.totalorder %s3774_s29, %s3213_s10  ;;  %p3218_p10 = scmp.lt.u32.totalorder %s3774_s29, %s3823_s5 }
 0x341   : > { %p3219_p1 = scmp.lt.u32.totalorder %s3217_s14, %s3213_s10  ;;  %p3221_p11 = scmp.lt.u32.totalorder %s3213_s10, %s3774_s29 }
 0x342   : > { %p3215_p8 = pnand %p3214_p5, %p3843_p12 }
 0x343   : > { %p3220_p4 = por %p3219_p1, %p3218_p10 }
 0x344   : > { %p3216_p9 = pneg %p3215_p8 }
 0x345   : > { %p3222_p0 = por %p3221_p11, %p3220_p4 }
 0x347   : > { %p3223_p2 = pnand %p3222_p0, %p3216_p9 }
 0x349   : > { %3226 = shalt.err (!%p3223_p2)
}
 0x34a   : > { %3024 = dma.vmem_to_hbm [thread:$0]  (%p3843_p12), %s3769_s11, 64, %s3774_s29, %s3743_s27  }
 0x34b PF: > { %s2434_s9 = sand.u32 1, %s3261_s20   ;;  %p3844_p7 = scmp.ne.s32.totalorder %s3830_s7, 0 }
 0x34c   : > { %p3845_p6 = scmp.ge.s32.totalorder %s3273_s23, 2  ;;  %s2435_s16 = scalar_lea.sflag [#allocation5], %s2434_s9 }
 0x34e   : > { %p3037_p3 = pnand %p3845_p6, %p3844_p7 }
 0x350   : > { %3252 = dma.done.wait (!%p3037_p3), %s2435_s16, 256  }
 0x351   : > { %3254 = vsyncadd (!%p3037_p3), %s2435_s16, 4294967040  ;;  %s2443_s13 = sand.u32 1, %s2565_s24  }
 0x352   : > { %s2444_s19 = scalar_lea.sflag [#allocation10], %s2443_s13 }
 0x353   : > { %3256 = dma.done.wait (!%p3037_p3), %s2444_s19, 192  }
 0x354   : > { %3258 = vsyncadd (!%p3037_p3), %s2444_s19, 4294967104  ;;  %p24_p12 = scmp.ge.s32.totalorder %s3349_s25, 4   ;;  %s3846_s20 = smov %s3265_s21 }
 0x355   : > { %s3847_s21 = smov %s3269_s22  ;;  %s3848_s22 = smov %s3361_s28 }
 0x356   : > { %s3849_s23 = smov %s3349_s25  ;;  %26 = sbr.rel (!%p24_p12) target bundleno = 10 (0xa), region = 129 }
 0x35d   :  { %2458 = vsyncpa [#allocation4], 1 }
 0x35e   :  { %2460 = vsyncpa [#allocation4 + $0x1], 1 }
 0x35f   :  { %2461 = vsyncpa [#allocation5], 1 }
 0x360   :  { %2463 = vsyncpa [#allocation5 + $0x1], 1 }
 0x361   :  { %2464 = vsyncpa [#allocation10], 1 }
 0x362   :  { %2466 = vsyncpa [#allocation10 + $0x1], 1 }
 0x363   :  { %2467 = vsyncpa [#allocation6], 1 }
 0x364   :  { %2469 = vsyncpa [#allocation6 + $0x1], 1 }

</bundles_post_ra>
